<compile_context>
chip_gen: v6e
topology: v6e:2x2x1
jax: 0.10.0
libtpu: 0.0.40
codegen_flags: <defaults>
</compile_context>

<pallas_src>
import functools
import math

import jax
import jax.numpy as jnp
from jax.experimental import pallas as pl
from jax.experimental.pallas import tpu as pltpu

# Problem configuration (mirrors NormWrapper("Instance", 2, 4, affine=True)).
BATCH = 2
CHANNELS = 4
H = W = 16
EPS = 1e-5


def _instance_norm_kernel(x_ref, gb_ref, o_ref, *, eps):
    """Normalize each (batch, channel) row of a (TB, TC, S) block.

    x_ref  : (TB, TC, S)  activations (any float dtype; math in f32)
    gb_ref : (2,  TC, 1)  packed [gamma; beta] for this channel tile
    o_ref  : (TB, TC, S)
    """
    x = x_ref[...].astype(jnp.float32)
    inv_s = 1.0 / x.shape[-1]                                # static

    # One-pass statistics: two independent lane (XLU) reductions.
    sum_x = jnp.sum(x, axis=-1, keepdims=True)               # (TB, TC, 1)
    sum_x2 = jnp.sum(x * x, axis=-1, keepdims=True)          # (TB, TC, 1)
    mean = sum_x * inv_s
    var = jnp.maximum(sum_x2 * inv_s - mean * mean, 0.0)     # biased, clamped

    gb = gb_ref[...]                                         # (2, TC, 1)
    gamma = gb[0:1]                                          # (1, TC, 1)
    beta = gb[1:2]                                           # (1, TC, 1)

    scale = jax.lax.rsqrt(var + eps) * gamma                 # (TB, TC, 1), EUP
    shift = beta - mean * scale                              # (TB, TC, 1)

    # Full-slab epilogue: just mul + add.
    o_ref[...] = (x * scale + shift).astype(o_ref.dtype)


def _choose_tiles(n, c, s, itemsize, budget_bytes):
    """Pick (batch_tile, channel_tile).  The full spatial axis stays inside
    every block so the reduction is single-pass (x read from HBM once).
    budget_bytes is per in/out block; with double buffering the pipeline uses
    ~4x that, sized to fit v7x's 64 MiB VMEM (and trivially v5e/v6e)."""
    row_bytes = max(1, s * itemsize)
    max_rows = max(1, budget_bytes // row_bytes)
    if n * c <= max_rows:
        return n, c                                  # single block, no grid
    if c <= max_rows:
        return max(1, max_rows // c), c              # tile batch, full channels
    # Tile channels too; sublane layout wants multiples of 8.
    tc = min(c, max(8, (max_rows // 8) * 8))
    # TODO(synk): if even a (1, 8, S) block exceeds the budget the spatial axis
    # would need a two-pass reduction; not needed for the sizes exercised here.
    return 1, tc


def instance_norm_pallas(x, weight=None, bias=None, *, eps=EPS,
                         block_budget_bytes=4 << 20):
    """InstanceNorm forward for NC[spatial...] input (n_dim agnostic).

    x      : (N, C, *spatial) floating point
    weight : (C,) gamma or None (affine=False -> ones)
    bias   : (C,) beta  or None (affine=False -> zeros)
    """
    n, c = x.shape[:2]
    s = math.prod(x.shape[2:])

    if weight is None:
        weight = jnp.ones((c,), jnp.float32)
    if bias is None:
        bias = jnp.zeros((c,), jnp.float32)

    x3 = x.reshape(n, c, s)                                  # contiguous, free
    # Pack gamma/beta into one tiny (2, C, 1) operand: one DMA stream, O(C) bytes.
    gb = jnp.stack([weight, bias], axis=0).astype(jnp.float32)[:, :, None]

    kernel = functools.partial(_instance_norm_kernel, eps=eps)
    tb, tc = _choose_tiles(n, c, s, jnp.dtype(x.dtype).itemsize,
                           block_budget_bytes)
    grid = (pl.cdiv(n, tb), pl.cdiv(c, tc))

    if grid == (1, 1):
        # Whole problem fits a single block: skip the grid/pipeline machinery.
        out3 = pl.pallas_call(
            kernel,
            out_shape=jax.ShapeDtypeStruct((n, c, s), x.dtype),
        )(x3, gb)
    else:
        out3 = pl.pallas_call(
            kernel,
            out_shape=jax.ShapeDtypeStruct((n, c, s), x.dtype),
            grid=grid,
            in_specs=[
                pl.BlockSpec((tb, tc, s), lambda bi, ci: (bi, ci, 0)),
                pl.BlockSpec((2, tc, 1), lambda bi, ci: (0, ci, 0)),
            ],
            out_specs=pl.BlockSpec((tb, tc, s), lambda bi, ci: (bi, ci, 0)),
            compiler_params=pltpu.CompilerParams(
                dimension_semantics=("parallel", "parallel")),
        )(x3, gb)

    return out3.reshape(x.shape)


def norm_wrapper_forward(x, weight=None, bias=None, *, norm_type="Instance",
                         n_dim=2, eps=EPS):
    """Mirrors NormWrapper.forward: identity if norm_type is None, else the
    chosen normalization (only the Instance branch is instantiated)."""
    if norm_type is None:
        return x
    if norm_type == "Instance":
        return instance_norm_pallas(x, weight, bias, eps=eps)
    raise NotImplementedError(
        f"norm_type={norm_type!r} not instantiated in this Pallas port")


def _reference_instance_norm(x, weight, bias, eps):
    axes = tuple(range(2, x.ndim))
    mean = jnp.mean(x, axis=axes, keepdims=True)
    var = jnp.mean((x - mean) ** 2, axis=axes, keepdims=True)
    xn = (x - mean) * jax.lax.rsqrt(var + eps)
    shape = (1, -1) + (1,) * (x.ndim - 2)
    return xn * weight.reshape(shape) + bias.reshape(shape)


if __name__ == "__main__":
    key = jax.random.PRNGKey(0)
    kx, kw, kb = jax.random.split(key, 3)

    x = jax.random.normal(kx, (BATCH, CHANNELS, H, W), dtype=jnp.float32)
    weight = jax.random.uniform(kw, (CHANNELS,), minval=0.5, maxval=1.5,
                                dtype=jnp.float32)
    bias = jax.random.uniform(kb, (CHANNELS,), minval=-0.5, maxval=0.5,
                              dtype=jnp.float32)

    ref = _reference_instance_norm(x, weight, bias, EPS)

    # Representative NormWrapper("Instance", 2, 4, affine=True) forward:
    # single-block (grid-free) path at this size.
    out = norm_wrapper_forward(x, weight, bias, norm_type="Instance", n_dim=2)
    out = jax.block_until_ready(out)
    assert out.shape == (BATCH, CHANNELS, H, W), out.shape
    assert jnp.allclose(out, ref, atol=1e-4, rtol=1e-4), (
        float(jnp.max(jnp.abs(out - ref))))

    # Also exercise the tiled multi-block path (forced small VMEM budget).
    out_tiled = instance_norm_pallas(x, weight, bias, block_budget_bytes=4096)
    out_tiled = jax.block_until_ready(out_tiled)
    assert jnp.allclose(out_tiled, ref, atol=1e-4, rtol=1e-4), (
        float(jnp.max(jnp.abs(out_tiled - ref))))

    # Identity branch (norm_type=None).
    out_id = norm_wrapper_forward(x, norm_type=None)
    assert jnp.array_equal(out_id, x)

    print("KERNEL_OK")
</pallas_src>

<mosaic_0001>
module attributes {stable_mosaic.version = 11 : i64} {
  func.func @_instance_norm_kernel(%arg0: memref<2x4x256xf32, #tpu.memory_space<vmem>>, %arg1: memref<2x4x1xf32, #tpu.memory_space<vmem>>, %arg2: memref<2x4x256xf32, #tpu.memory_space<vmem>>) attributes {dimension_semantics = [], scalar_prefetch = 0 : i64, scratch_operands = 0 : i64, tpu.core_type = #tpu.core_type<tc>} {
    %c0 = arith.constant 0 : index
    %c0_0 = arith.constant 0 : index
    %c0_1 = arith.constant 0 : index
    %0 = vector.load %arg0[%c0, %c0_0, %c0_1] : memref<2x4x256xf32, #tpu.memory_space<vmem>>, vector<2x4x256xf32>
    %cst = arith.constant dense<0.000000e+00> : vector<2x4xf32>
    %1 = vector.multi_reduction <add>, %0, %cst [2] : vector<2x4x256xf32> to vector<2x4xf32>
    %2 = vector.shape_cast %1 : vector<2x4xf32> to vector<2x4x1xf32>
    %3 = arith.mulf %0, %0 : vector<2x4x256xf32>
    %cst_2 = arith.constant dense<0.000000e+00> : vector<2x4xf32>
    %4 = vector.multi_reduction <add>, %3, %cst_2 [2] : vector<2x4x256xf32> to vector<2x4xf32>
    %5 = vector.shape_cast %4 : vector<2x4xf32> to vector<2x4x1xf32>
    %cst_3 = arith.constant 3.906250e-03 : f32
    %6 = vector.broadcast %cst_3 : f32 to vector<2x4x1xf32>
    %7 = arith.mulf %2, %6 : vector<2x4x1xf32>
    %cst_4 = arith.constant 3.906250e-03 : f32
    %8 = vector.broadcast %cst_4 : f32 to vector<2x4x1xf32>
    %9 = arith.mulf %5, %8 : vector<2x4x1xf32>
    %10 = arith.mulf %7, %7 : vector<2x4x1xf32>
    %11 = arith.subf %9, %10 : vector<2x4x1xf32>
    %cst_5 = arith.constant 0.000000e+00 : f32
    %12 = vector.broadcast %cst_5 : f32 to vector<2x4x1xf32>
    %13 = arith.maximumf %11, %12 : vector<2x4x1xf32>
    %c0_6 = arith.constant 0 : index
    %c0_7 = arith.constant 0 : index
    %c0_8 = arith.constant 0 : index
    %14 = vector.load %arg1[%c0_6, %c0_7, %c0_8] : memref<2x4x1xf32, #tpu.memory_space<vmem>>, vector<2x4x1xf32>
    %15 = vector.extract_strided_slice %14 {offsets = [0, 0, 0], sizes = [1, 4, 1], strides = [1, 1, 1]} : vector<2x4x1xf32> to vector<1x4x1xf32>
    %16 = vector.extract_strided_slice %14 {offsets = [1, 0, 0], sizes = [1, 4, 1], strides = [1, 1, 1]} : vector<2x4x1xf32> to vector<1x4x1xf32>
    %cst_9 = arith.constant 9.99999974E-6 : f32
    %17 = vector.broadcast %cst_9 : f32 to vector<2x4x1xf32>
    %18 = arith.addf %13, %17 : vector<2x4x1xf32>
    %19 = math.rsqrt %18 : vector<2x4x1xf32>
    %20 = vector.broadcast %15 : vector<1x4x1xf32> to vector<2x4x1xf32>
    %21 = arith.mulf %19, %20 : vector<2x4x1xf32>
    %22 = arith.mulf %7, %21 : vector<2x4x1xf32>
    %23 = vector.broadcast %16 : vector<1x4x1xf32> to vector<2x4x1xf32>
    %24 = arith.subf %23, %22 : vector<2x4x1xf32>
    %25 = vector.broadcast %21 : vector<2x4x1xf32> to vector<2x4x256xf32>
    %26 = arith.mulf %0, %25 : vector<2x4x256xf32>
    %27 = vector.broadcast %24 : vector<2x4x1xf32> to vector<2x4x256xf32>
    %28 = arith.addf %26, %27 : vector<2x4x256xf32>
    %c0_10 = arith.constant 0 : index
    %c0_11 = arith.constant 0 : index
    %c0_12 = arith.constant 0 : index
    %29 = vector.load %arg2[%c0_10, %c0_11, %c0_12] : memref<2x4x256xf32, #tpu.memory_space<vmem>>, vector<2x4x256xf32>
    tpu.vector_store %arg2[%c0_10, %c0_11, %c0_12], %28 {strides = array<i32>} : memref<2x4x256xf32, #tpu.memory_space<vmem>>, vector<2x4x256xf32>,
    return
  }
}

</mosaic_0001>

<bundles_post_ra>
// kernel: tpu_custom_call.1
= control target key start
LH: loop header
LB: loop body
LE: loop exit
PB: predicated region body
PF: predicated region fallthrough
CT: control target
= control target key end

     0   :  { %7 = vsyncpa [#allocation3], 0  ;;  %s277_s0 = inlined_call_operand.hbm [shape: f32[2,4,256], index: 0, kind: input, shape index: {}]   ;;  %s278_s1 = inlined_call_operand.vmem [shape: f32[2,4,1], index: 1, kind: input, shape index: {}]   ;;  %s279_s2 = inlined_call_operand.hbm [shape: f32[2,4,256], index: 2, kind: output, shape index: {}]  }
   0x1   :  { %8 = vsyncpa [#allocation4], 0  ;;  %s214_s9 = smov [#allocation2]  }
   0x2   :  { %s14_s10 = sshll.u32 %s214_s9, 4  ;;  %s15_s10 = int_to_ptr.vmem [resolvable:$true] %s14_s10 }
   0x3   :  { %s178_s11 = scalar_lea.vmem %s15_s10, 256  ;;  %p183_p1 = scmp.lt.s32.totalorder %s15_s10, %s15_s10 }
   0x4   :  { %p179_p0 = scmp.ne.s32.totalorder %s15_s10, %s178_s11  ;;  %p184_p2 = scmp.lt.s32.totalorder %s178_s11, %s178_s11 }
   0x6   :  { %p185_p3 = por %p184_p2, %p183_p1 }
   0x8   :  { %p186_p4 = pnand %p185_p3, %p179_p0 }
   0xa   :  { %189 = shalt.err (!%p186_p4)
}
   0xb   :  { %s215_s12 = smov 128   ;;  %s216_s13 = smov 8  }
   0xc   :  { %20 = dma.hbm_to_vmem [thread:$0]  %s277_s0, 256, %s15_s10, [#allocation3], %s215_s12, %s215_s12, %s216_s13  }
   0xd   :  { %210 = dma.done.wait [#allocation3], 256  }
   0xe   :  { %211 = vsyncadd [#allocation3], 4294967040  ;;  %vm34_vm0 = vcmask 1043456   ;;  %v241_v0 = vld [vmem:[#allocation2] sm:$0xff]  ;;  %v243_v1 = vld [vmem:[#allocation2 + $0x8] sm:$0xff]  ;;  %v217_v20 = vmov 0   ;;  %v96_v49 = vlaneseq }
   0xf   :  { %v30_v2 = vcombine.high %v241_v0, %v241_v0  ;;  %v35_v3 = vsel %vm34_vm0, %v241_v0, 0.0  ;;  %v45_v4 = vmul.f32 %v241_v0, %v241_v0  ;;  %v31_v5 = vcombine.high %v243_v1, %v243_v1  ;;  %162 = vset.pattern.permute.xlu0 %v217_v20  ;;  %163 = vset.pattern.permute.xlu1 %v217_v20  ;;  %v73_v37 = vld [vmem:[%s278_s1] sm:$0xf]  ;;  %v74_v43 = vld [vmem:[%s278_s1 + $0x4] sm:$0xf]  ;;  %s219_s1 = smov [#allocation5]  }
  0x10   :  { %v40_v6 = vsel %vm34_vm0, %v243_v1, 0.0  ;;  %v46_v7 = vmul.f32 %v243_v1, %v243_v1  ;;  %v218_v47 = vmov 839922192   ;;  %v97_v51 = vshrl.u32 %v96_v49, 7  ;;  %s144_s19 = sshll.u32 %s219_s1, 4  ;;  %s145_s19 = int_to_ptr.vmem [resolvable:$true] %s144_s19 }
  0x11   :  { %v36_v8 = vsel %vm34_vm0, %v30_v2, 0.0  ;;  %v49_v9 = vcombine.high %v45_v4, %v45_v4  ;;  %v53_v10 = vsel %vm34_vm0, %v45_v4, 0.0  ;;  %v41_v11 = vsel %vm34_vm0, %v31_v5, 0.0  ;;  %s190_s20 = scalar_lea.vmem %s145_s19, 256  ;;  %p195_p6 = scmp.lt.s32.totalorder %s145_s19, %s145_s19 }
  0x12   :  { %v37_v12 = vadd.f32 %v36_v8, %v35_v3  ;;  %v50_v13 = vcombine.high %v46_v7, %v46_v7  ;;  %v58_v15 = vsel %vm34_vm0, %v46_v7, 0.0  ;;  %v42_v17 = vadd.f32 %v41_v11, %v40_v6  ;;  %p191_p5 = scmp.ne.s32.totalorder %s145_s19, %s190_s20  ;;  %p196_p7 = scmp.lt.s32.totalorder %s190_s20, %s190_s20 }
  0x13   :  { %v54_v14 = vsel %vm34_vm0, %v49_v9, 0.0  ;;  %v94_v48 = vunpack.c.l.s4 %v218_v47 }
  0x14   :  { %38 = vadd.xlane.f32.xlu0 %v37_v12  ;;  %v55_v16 = vadd.f32 %v54_v14, %v53_v10  ;;  %v59_v18 = vsel %vm34_vm0, %v50_v13, 0.0  ;;  %p197_p8 = por %p196_p7, %p195_p6 }
  0x15   :  { %v60_v19 = vadd.f32 %v59_v18, %v58_v15  ;;  %v95_v50 = vunpack.c.0.s8 %v94_v48 }
  0x16   :  { %56 = vadd.xlane.f32.xlu1 %v55_v16  ;;  %p198_p9 = pnand %p197_p8, %p191_p5 }
  0x17   :  { %v98_v52 = vsub.s32 %v95_v50, %v97_v51 }
  0x18   :  { %43 = vadd.xlane.f32.xlu0 %v42_v17 }
  0x1a   :  { %61 = vadd.xlane.f32.xlu1 %v60_v19 }
  0x9d   :  { %v39_v21 = vpop.xlane.xlu0 %38 }
  0x9e   :  { %v63_v22 = vmul.f32 0.00390625, %v39_v21 }
  0x9f   :  { %v57_v23 = vpop.xlane.xlu1 %56 }
  0xa0   :  { %v67_v24 = vmul.f32 %v63_v22, %v63_v22  ;;  %v65_v25 = vmul.f32 0.00390625, %v57_v23 }
  0xa1   :  { %v44_v26 = vpop.xlane.xlu0 %43 }
  0xa2   :  { %v69_v27 = vsub.f32 %v65_v25, %v67_v24  ;;  %v64_v28 = vmul.f32 0.00390625, %v44_v26 }
  0xa3   :  { %v62_v29 = vpop.xlane.xlu1 %61 }
  0xa4   :  { %v71_v30 = vmax.f32 %v69_v27, 0.0  ;;  %v68_v31 = vmul.f32 %v64_v28, %v64_v28  ;;  %v66_v32 = vmul.f32 0.00390625, %v62_v29 }
  0xa6   :  { %v75_v33 = vadd.f32 1e-05, %v71_v30  ;;  %v70_v34 = vsub.f32 %v66_v32, %v68_v31 }
  0xa8   :  { %166 = vrsqrt.f32 %v75_v33  ;;  %v72_v35 = vmax.f32 %v70_v34, 0.0 }
  0xaa   :  { %v76_v36 = vadd.f32 1e-05, %v72_v35 }
  0xac   :  { %168 = vrsqrt.f32 %v76_v36 }
  0xb5   :  { %v167_v38 = vpop.eup %166 }
  0xb6   :  { %v79_v39 = vmul.f32 %v167_v38, %v73_v37 }
  0xb8   :  { %87 = vperm.xlu0 %162, %v79_v39   ;;  %v81_v42 = vmul.f32 %v79_v39, %v63_v22 }
  0xb9   :  { %v169_v40 = vpop.eup %168 }
  0xba   :  { %v80_v41 = vmul.f32 %v169_v40, %v73_v37  ;;  %v83_v44 = vsub.f32 %v74_v43, %v81_v42 }
  0xbc   :  { %91 = vperm.xlu1 %163, %v80_v41   ;;  %v82_v45 = vmul.f32 %v80_v41, %v64_v28 }
  0xbe   :  { %v84_v46 = vsub.f32 %v74_v43, %v82_v45 }
  0xc0   :  { %113 = vperm.xlu1 %163, %v83_v44  }
  0xc4   :  { %117 = vperm.xlu1 %163, %v84_v46  }
 0x133   :  { %v88_v53 = vpop.permute.xlu0 %87 }
 0x134   :  { %v99_v55 = vrot.slane %v88_v53, %v98_v52 }
 0x136   :  { %v109_v57 = vmul.f32 %v99_v55, %v241_v0 }
 0x137   :  { %v92_v54 = vpop.permute.xlu1 %91 }
 0x138   :  { %v106_v58 = vrot.slane %v92_v54, %v98_v52 }
 0x13a   :  { %v110_v62 = vmul.f32 %v106_v58, %v243_v1 }
 0x13b   :  { %v114_v56 = vpop.permute.xlu1 %113 }
 0x13c   :  { %v125_v59 = vrot.slane %v114_v56, %v98_v52 }
 0x13e   :  { %v135_v60 = vadd.f32 %v125_v59, %v109_v57 }
 0x13f   :  { %v118_v61 = vpop.permute.xlu1 %117 }
 0x140   :  { %137 = vst [vmem:[#allocation5] sm:$0xff] %v135_v60  ;;  %v132_v63 = vrot.slane %v118_v61, %v98_v52 }
 0x142   :  { %v136_v2 = vadd.f32 %v132_v63, %v110_v62 }
 0x144   :  { %138 = vst [vmem:[#allocation5 + $0x8] sm:$0xff] %v136_v2 }
 0x145   :  { %201 = shalt.err (!%p198_p9)
}
 0x146   :  { %150 = dma.vmem_to_hbm [thread:$0]  %s145_s19, 256, %s279_s2, [#allocation4], %s215_s12, %s215_s12, %s216_s13  }
 0x147   :  { %212 = dma.done.wait [#allocation4], 256  }
 0x148   :  { %213 = vsyncadd [#allocation4], 4294967040 }
 0x149   :  { %154 = vsyncpa [#allocation3], 1 }
 0x14a   :  { %155 = vsyncpa [#allocation4], 1 }

</bundles_post_ra>
